<compile_context>
chip_gen: v6e
topology: v6e:2x2x1
jax: 0.10.0
libtpu: 0.0.40
codegen_flags: <defaults>
</compile_context>

<pallas_src>
import functools

import jax
import jax.numpy as jnp
from jax.experimental import pallas as pl
from jax.experimental.pallas import tpu as pltpu

# Module-level constants from the original file (laser beams + robot state).
_L = 60            # number of laser beams
_RS = 4            # robot-state dims
IN_DIM = _L + _RS  # 64
HIDDEN = 64        # first body layer
FEATURE_DIM = 32   # feature_dim (second body layer output)
PI_DIM = 32        # last_layer_dim_pi
VF_DIM = 32        # last_layer_dim_vf
HEAD_DIM = PI_DIM + VF_DIM  # fused pi|vf head width = 64

# 2-way row packing: two batch rows share one 128-lane vector row.
PACK = 2
P_IN = IN_DIM * PACK        # 128
P_HID = HIDDEN * PACK       # 128
P_FEAT = FEATURE_DIM * PACK  # 64
P_HEAD = HEAD_DIM * PACK    # 128
ROW_GRAN = PACK * 8         # batch granularity: 8 sublanes of packed rows


def _round_up(x, m):
    return (x + m - 1) // m * m


def _mlp_arena2d_kernel(x_ref,
                        w1_ref, b1_ref,
                        w2_ref, b2_ref,
                        wh_ref, bh_ref,
                        out_ref):
    # x_ref: (tile/2, 128) = two batch rows packed along lanes.
    # Block-diagonal weights keep the two packed rows independent.
    x = x_ref[...]

    # body_net: Linear -> ReLU -> Linear -> ReLU
    h1 = jnp.dot(x, w1_ref[...], preferred_element_type=jnp.float32) + b1_ref[...]
    h1 = jnp.maximum(h1, 0.0)
    h2 = jnp.dot(h1, w2_ref[...], preferred_element_type=jnp.float32) + b2_ref[...]
    h2 = jnp.maximum(h2, 0.0)

    # fused policy_net | value_net: one matmul, one lane-dense 128-wide store.
    head = jnp.dot(h2, wh_ref[...], preferred_element_type=jnp.float32) + bh_ref[...]
    out_ref[...] = jnp.maximum(head, 0.0).astype(out_ref.dtype)


def prepare_params(params):
    """One-time prep: transpose to (in, out), fuse heads, build block-diag."""
    w1 = params["w1"].T.astype(jnp.float32)                               # (64, 64)
    w2 = params["w2"].T.astype(jnp.float32)                               # (64, 32)
    wh = jnp.concatenate([params["wp"].T, params["wv"].T], 1).astype(jnp.float32)  # (32, 64)
    b1 = params["b1"].astype(jnp.float32)
    b2 = params["b2"].astype(jnp.float32)
    bh = jnp.concatenate([params["bp"], params["bv"]]).astype(jnp.float32)

    eye = jnp.eye(PACK, dtype=jnp.float32)

    def blockdiag(w):
        return jnp.kron(eye, w)

    def tiled_bias(b):
        return jnp.tile(b, PACK).reshape(1, PACK * b.shape[0])

    return dict(
        w1=blockdiag(w1),       # (128, 128)
        b1=tiled_bias(b1),      # (1, 128)
        w2=blockdiag(w2),       # (128, 64)
        b2=tiled_bias(b2),      # (1, 64)
        wh=blockdiag(wh),       # (64, 128)
        bh=tiled_bias(bh),      # (1, 128)
    )


@functools.partial(jax.jit, static_argnames=("batch_tile", "fused_output"))
def mlp_arena2d_forward(features, prepped, batch_tile=4096, fused_output=False):
    """features: (B, _L + _RS) float32.

    Returns (latent_pi, latent_vf) by default, or the fused (B, 64) pi|vf
    latent when fused_output=True (avoids the two strided slice copies on the
    standalone path; the consumer can slice lazily).
    """
    B, D = features.shape
    assert D == IN_DIM

    # Effective tile (in batch rows): multiple of ROW_GRAN, clamped to batch.
    tile = _round_up(max(ROW_GRAN, min(batch_tile, _round_up(B, ROW_GRAN))),
                     ROW_GRAN)
    B_pad = _round_up(B, tile)
    x = features if B_pad == B else jnp.pad(features, ((0, B_pad - B), (0, 0)))

    # Free reinterpretation: pack two consecutive rows into one 128-lane row.
    x_packed = x.reshape(B_pad // PACK, P_IN)
    tile_p = tile // PACK
    grid = (B_pad // tile,)

    def full(shape):
        # whole-array block, same block every grid step (weights stay resident)
        return pl.BlockSpec(shape, lambda i: (0, 0))

    out = pl.pallas_call(
        _mlp_arena2d_kernel,
        out_shape=jax.ShapeDtypeStruct((B_pad // PACK, P_HEAD), jnp.float32),
        grid_spec=pltpu.PrefetchScalarGridSpec(
            num_scalar_prefetch=0,
            grid=grid,
            in_specs=[
                pl.BlockSpec((tile_p, P_IN), lambda i: (i, 0)),   # packed x tile
                full((P_IN, P_HID)), full((1, P_HID)),
                full((P_HID, P_FEAT)), full((1, P_FEAT)),
                full((P_FEAT, P_HEAD)), full((1, P_HEAD)),
            ],
            out_specs=pl.BlockSpec((tile_p, P_HEAD), lambda i: (i, 0)),
        ),
        compiler_params=pltpu.CompilerParams(
            dimension_semantics=("parallel",)),
    )(x_packed, prepped["w1"], prepped["b1"], prepped["w2"], prepped["b2"],
      prepped["wh"], prepped["bh"])

    # Free unpack back to (B_pad, 64) = pi|vf per row.
    fused = out.reshape(B_pad, HEAD_DIM)

    if fused_output:
        return fused if B_pad == B else fused[:B]
    return fused[:B, :PI_DIM], fused[:B, PI_DIM:]


def init_params(key):
    """Deterministic PyTorch-like init: U(-1/sqrt(fan_in), 1/sqrt(fan_in))."""
    ks = jax.random.split(key, 8)

    def lin(kw, kb, out_dim, in_dim):
        bound = 1.0 / jnp.sqrt(in_dim)
        w = jax.random.uniform(kw, (out_dim, in_dim), jnp.float32, -bound, bound)
        b = jax.random.uniform(kb, (out_dim,), jnp.float32, -bound, bound)
        return w, b

    w1, b1 = lin(ks[0], ks[1], HIDDEN, IN_DIM)
    w2, b2 = lin(ks[2], ks[3], FEATURE_DIM, HIDDEN)
    wp, bp = lin(ks[4], ks[5], PI_DIM, FEATURE_DIM)
    wv, bv = lin(ks[6], ks[7], VF_DIM, FEATURE_DIM)
    return dict(w1=w1, b1=b1, w2=w2, b2=b2, wp=wp, bp=bp, wv=wv, bv=bv)


def reference_forward(features, params):
    """Pure-JAX reference matching the PyTorch semantics."""
    h = jnp.maximum(features @ params["w1"].T + params["b1"], 0.0)
    h = jnp.maximum(h @ params["w2"].T + params["b2"], 0.0)
    pi = jnp.maximum(h @ params["wp"].T + params["bp"], 0.0)
    vf = jnp.maximum(h @ params["wv"].T + params["bv"], 0.0)
    return pi, vf


if __name__ == "__main__":
    key = jax.random.PRNGKey(0)
    k_param, k_x = jax.random.split(key)

    params = init_params(k_param)
    prepped = prepare_params(params)

    # batch=512 with batch_tile=128 -> grid of 4 steps: several steps per
    # TensorCore on v7x and real DMA/compute pipelining on all chips.
    batch = 512
    features = jax.random.normal(k_x, (batch, IN_DIM), jnp.float32)
    pi_ref, vf_ref = reference_forward(features, params)

    pi, vf = mlp_arena2d_forward(features, prepped, batch_tile=128)
    pi = jax.block_until_ready(pi)
    vf = jax.block_until_ready(vf)
    assert pi.shape == (batch, PI_DIM) and vf.shape == (batch, VF_DIM)
    assert jnp.allclose(pi, pi_ref, atol=1e-4, rtol=1e-4)
    assert jnp.allclose(vf, vf_ref, atol=1e-4, rtol=1e-4)

    # Default (large) tile path: single grid step, no wrapper slice copies.
    fused = mlp_arena2d_forward(features, prepped, fused_output=True)
    fused = jax.block_until_ready(fused)
    assert fused.shape == (batch, HEAD_DIM)
    assert jnp.allclose(fused[:, :PI_DIM], pi_ref, atol=1e-4, rtol=1e-4)
    assert jnp.allclose(fused[:, PI_DIM:], vf_ref, atol=1e-4, rtol=1e-4)

    # Non-multiple batch (padding path).
    pi2, vf2 = mlp_arena2d_forward(features[:37], prepped, batch_tile=128)
    jax.block_until_ready(pi2)
    assert jnp.allclose(pi2, pi_ref[:37], atol=1e-4, rtol=1e-4)
    assert jnp.allclose(vf2, vf_ref[:37], atol=1e-4, rtol=1e-4)

    print("KERNEL_OK")
</pallas_src>

<mosaic_0001>
module attributes {stable_mosaic.version = 11 : i64} {
  func.func @_mlp_arena2d_kernel(%arg0: i32, %arg1: memref<64x128xf32, #tpu.memory_space<vmem>>, %arg2: memref<128x128xf32, #tpu.memory_space<vmem>>, %arg3: memref<1x128xf32, #tpu.memory_space<vmem>>, %arg4: memref<128x64xf32, #tpu.memory_space<vmem>>, %arg5: memref<1x64xf32, #tpu.memory_space<vmem>>, %arg6: memref<64x128xf32, #tpu.memory_space<vmem>>, %arg7: memref<1x128xf32, #tpu.memory_space<vmem>>, %arg8: memref<64x128xf32, #tpu.memory_space<vmem>>) attributes {dimension_semantics = [#tpu.dimension_semantics<parallel>], iteration_bounds = array<i64: 4>, scalar_prefetch = 0 : i64, scratch_operands = 0 : i64, tpu.core_type = #tpu.core_type<tc>, window_params = [{transform_indices = @transform_0, window_bounds = array<i64: 64, 128>}, {pipeline_mode = #tpu.pipeline_mode<synchronous>, transform_indices = @transform_1, window_bounds = array<i64: 128, 128>}, {pipeline_mode = #tpu.pipeline_mode<synchronous>, transform_indices = @transform_2, window_bounds = array<i64: 1, 128>}, {pipeline_mode = #tpu.pipeline_mode<synchronous>, transform_indices = @transform_3, window_bounds = array<i64: 128, 64>}, {pipeline_mode = #tpu.pipeline_mode<synchronous>, transform_indices = @transform_4, window_bounds = array<i64: 1, 64>}, {pipeline_mode = #tpu.pipeline_mode<synchronous>, transform_indices = @transform_5, window_bounds = array<i64: 64, 128>}, {pipeline_mode = #tpu.pipeline_mode<synchronous>, transform_indices = @transform_6, window_bounds = array<i64: 1, 128>}, {transform_indices = @transform_7, window_bounds = array<i64: 64, 128>}]} {
    %c0 = arith.constant 0 : index
    %c0_0 = arith.constant 0 : index
    %0 = vector.load %arg1[%c0, %c0_0] : memref<64x128xf32, #tpu.memory_space<vmem>>, vector<64x128xf32>
    %c0_1 = arith.constant 0 : index
    %c0_2 = arith.constant 0 : index
    %1 = vector.load %arg2[%c0_1, %c0_2] : memref<128x128xf32, #tpu.memory_space<vmem>>, vector<128x128xf32>
    %cst = arith.constant dense<0.000000e+00> : vector<64x128xf32>
    %2 = tpu.matmul %0, %1, %cst {dimension_numbers = #tpu.dot_dimension_numbers<[1], [0], [0], [1], [0, 0, 1, 1], [], []>} : vector<64x128xf32>, vector<128x128xf32>, vector<64x128xf32> -> vector<64x128xf32>
    %c0_3 = arith.constant 0 : index
    %c0_4 = arith.constant 0 : index
    %3 = vector.load %arg3[%c0_3, %c0_4] : memref<1x128xf32, #tpu.memory_space<vmem>>, vector<1x128xf32>
    %4 = vector.broadcast %3 : vector<1x128xf32> to vector<64x128xf32>
    %5 = arith.addf %2, %4 : vector<64x128xf32>
    %cst_5 = arith.constant 0.000000e+00 : f32
    %6 = vector.broadcast %cst_5 : f32 to vector<64x128xf32>
    %7 = arith.maximumf %5, %6 : vector<64x128xf32>
    %c0_6 = arith.constant 0 : index
    %c0_7 = arith.constant 0 : index
    %8 = vector.load %arg4[%c0_6, %c0_7] : memref<128x64xf32, #tpu.memory_space<vmem>>, vector<128x64xf32>
    %cst_8 = arith.constant dense<0.000000e+00> : vector<64x64xf32>
    %9 = tpu.matmul %7, %8, %cst_8 {dimension_numbers = #tpu.dot_dimension_numbers<[1], [0], [0], [1], [0, 0, 1, 1], [], []>} : vector<64x128xf32>, vector<128x64xf32>, vector<64x64xf32> -> vector<64x64xf32>
    %c0_9 = arith.constant 0 : index
    %c0_10 = arith.constant 0 : index
    %10 = vector.load %arg5[%c0_9, %c0_10] : memref<1x64xf32, #tpu.memory_space<vmem>>, vector<1x64xf32>
    %11 = vector.broadcast %10 : vector<1x64xf32> to vector<64x64xf32>
    %12 = arith.addf %9, %11 : vector<64x64xf32>
    %cst_11 = arith.constant 0.000000e+00 : f32
    %13 = vector.broadcast %cst_11 : f32 to vector<64x64xf32>
    %14 = arith.maximumf %12, %13 : vector<64x64xf32>
    %c0_12 = arith.constant 0 : index
    %c0_13 = arith.constant 0 : index
    %15 = vector.load %arg6[%c0_12, %c0_13] : memref<64x128xf32, #tpu.memory_space<vmem>>, vector<64x128xf32>
    %cst_14 = arith.constant dense<0.000000e+00> : vector<64x128xf32>
    %16 = tpu.matmul %14, %15, %cst_14 {dimension_numbers = #tpu.dot_dimension_numbers<[1], [0], [0], [1], [0, 0, 1, 1], [], []>} : vector<64x64xf32>, vector<64x128xf32>, vector<64x128xf32> -> vector<64x128xf32>
    %c0_15 = arith.constant 0 : index
    %c0_16 = arith.constant 0 : index
    %17 = vector.load %arg7[%c0_15, %c0_16] : memref<1x128xf32, #tpu.memory_space<vmem>>, vector<1x128xf32>
    %18 = vector.broadcast %17 : vector<1x128xf32> to vector<64x128xf32>
    %19 = arith.addf %16, %18 : vector<64x128xf32>
    %cst_17 = arith.constant 0.000000e+00 : f32
    %20 = vector.broadcast %cst_17 : f32 to vector<64x128xf32>
    %21 = arith.maximumf %19, %20 : vector<64x128xf32>
    %c0_18 = arith.constant 0 : index
    %c0_19 = arith.constant 0 : index
    %22 = vector.load %arg8[%c0_18, %c0_19] : memref<64x128xf32, #tpu.memory_space<vmem>>, vector<64x128xf32>
    tpu.vector_store %arg8[%c0_18, %c0_19], %21 {strides = array<i32>} : memref<64x128xf32, #tpu.memory_space<vmem>>, vector<64x128xf32>,
    return
  }
  func.func @transform_0(%arg0: i32) -> (i32, i32) {
    %c0_i32 = arith.constant 0 : i32
    %c0_i32_0 = arith.constant 0 : i32
    return %arg0, %c0_i32 : i32, i32
  }
  func.func @transform_1(%arg0: i32) -> (i32, i32) {
    %c0_i32 = arith.constant 0 : i32
    %c0_i32_0 = arith.constant 0 : i32
    %c0_i32_1 = arith.constant 0 : i32
    return %c0_i32, %c0_i32_0 : i32, i32
  }
  func.func @transform_2(%arg0: i32) -> (i32, i32) {
    %c0_i32 = arith.constant 0 : i32
    %c0_i32_0 = arith.constant 0 : i32
    %c0_i32_1 = arith.constant 0 : i32
    return %c0_i32, %c0_i32_0 : i32, i32
  }
  func.func @transform_3(%arg0: i32) -> (i32, i32) {
    %c0_i32 = arith.constant 0 : i32
    %c0_i32_0 = arith.constant 0 : i32
    %c0_i32_1 = arith.constant 0 : i32
    return %c0_i32, %c0_i32_0 : i32, i32
  }
  func.func @transform_4(%arg0: i32) -> (i32, i32) {
    %c0_i32 = arith.constant 0 : i32
    %c0_i32_0 = arith.constant 0 : i32
    %c0_i32_1 = arith.constant 0 : i32
    return %c0_i32, %c0_i32_0 : i32, i32
  }
  func.func @transform_5(%arg0: i32) -> (i32, i32) {
    %c0_i32 = arith.constant 0 : i32
    %c0_i32_0 = arith.constant 0 : i32
    %c0_i32_1 = arith.constant 0 : i32
    return %c0_i32, %c0_i32_0 : i32, i32
  }
  func.func @transform_6(%arg0: i32) -> (i32, i32) {
    %c0_i32 = arith.constant 0 : i32
    %c0_i32_0 = arith.constant 0 : i32
    %c0_i32_1 = arith.constant 0 : i32
    return %c0_i32, %c0_i32_0 : i32, i32
  }
  func.func @transform_7(%arg0: i32) -> (i32, i32) {
    %c0_i32 = arith.constant 0 : i32
    %c0_i32_0 = arith.constant 0 : i32
    return %arg0, %c0_i32 : i32, i32
  }
}

</mosaic_0001>

<bundles_post_ra>
// kernel: mlp_arena2d_forward.1
= control target key start
LH: loop header
LB: loop body
LE: loop exit
PB: predicated region body
PF: predicated region fallthrough
CT: control target
= control target key end

     0   :  { %s1053_s24 = smov 0   ;;  %s1224_s0 = inlined_call_operand.vmem [shape: f32[256,128], index: 0, kind: input, shape index: {}]   ;;  %s1225_s1 = inlined_call_operand.vmem [shape: f32[128,128], index: 1, kind: input, shape index: {}]   ;;  %s1226_s2 = inlined_call_operand.vmem [shape: f32[1,128], index: 2, kind: input, shape index: {}]   ;;  %s1227_s3 = inlined_call_operand.vmem [shape: f32[128,64], index: 3, kind: input, shape index: {}]   ;;  %s1228_s4 = inlined_call_operand.vmem [shape: f32[1,64], index: 4, kind: input, shape index: {}]   ;;  %s1229_s5 = inlined_call_operand.vmem [shape: f32[64,128], index: 5, kind: input, shape index: {}]   ;;  %s1230_s6 = inlined_call_operand.vmem [shape: f32[1,128], index: 6, kind: input, shape index: {}]   ;;  %s1231_s7 = inlined_call_operand.vmem [shape: f32[256,128], index: 7, kind: output, shape index: {}]  }
   0x1 LB: > { %s779_s25 = sadd.s32 4294967295, %s1011_s24   ;;  %p783_p0 = scmp.ge.s32.totalorder %s1011_s24, 1  ;;  %s1011_s24 = sphi %s1053_s24, %s17_s24  }
   0x2   : > { %p238_p1 = scmp.lt.s32.totalorder %s1011_s24, 5 }
   0x4   : > { %p239_p2 = pnand %p783_p0, %p238_p1 }
   0x5   : > { %s784_s30 = sshll.u32 (!%p239_p2), %s779_s25, 3 }
   0x6   : > { %242 = sbr.rel (%p239_p2) target bundleno = 656 (0x290), region = 48  ;;  %p271_p3 = scmp.lt.s32.totalorder (!%p239_p2), %s784_s30, 31 }
   0xb   : > { %v305_v0 = vld [vmem:[%s1225_s1 + $0x78] sm:$0xff]  ;;  %v304_v1 = vld [vmem:[%s1225_s1 + $0x70] sm:$0xff]  ;;  %v303_v2 = vld [vmem:[%s1225_s1 + $0x68] sm:$0xff]  ;;  %s1233_s30 = smov (!%p271_p3, %s784_s30), 31  ;;  %vm577_vm0 = vcmask 523264  }
   0xc   : > { %865 = vmatprep.subr.mxu0 %v305_v0  ;;  %v302_v3 = vld [vmem:[%s1225_s1 + $0x60] sm:$0xff]  ;;  %s785_s12 = sshll.u32 %s1233_s30, 3  ;;  %v441_v4 = vld [vmem:[%s1227_s3 + $0x78] sm:$0xff]  ;;  %v440_v6 = vld [vmem:[%s1227_s3 + $0x70] sm:$0xff] }
   0xd   : > { %866 = vmatpush3.msra.mxu0 %v305_v0  ;;  %v301_v5 = vld [vmem:[%s1225_s1 + $0x58] sm:$0xff]  ;;  %s1087_s19 = scalar_lea.vmem %s1224_s0, %s785_s12  ;;  %909 = vmatprep.subr.mxu1 %v441_v4  ;;  %v300_v8 = vld [vmem:[%s1225_s1 + $0x50] sm:$0xff]  ;;  %v439_v9 = vld [vmem:[%s1227_s3 + $0x68] sm:$0xff]  ;;  %s280_s17 = scalar_lea.vmem %s1231_s7, %s785_s12 }
   0xe   : > { %867 = vmatprep.subr.mxu0 %v304_v1  ;;  %v282_v7 = vld [vmem:[%s1087_s19] sm:$0xff]  ;;  %910 = vmatpush3.msra.mxu1 %v441_v4  ;;  %v299_v10 = vld [vmem:[%s1225_s1 + $0x48] sm:$0xff]  ;;  %v437_v13 = vld [vmem:[%s1227_s3 + $0x58] sm:$0xff] }
   0xf   : > { %868 = vmatpush3.msra.mxu0 %v304_v1  ;;  %897 = vmatprep.mubr.f32.mxu0 %v282_v7  ;;  %v438_v11 = vld [vmem:[%s1227_s3 + $0x60] sm:$0xff]  ;;  %v297_v14 = vld [vmem:[%s1225_s1 + $0x38] sm:$0xff]  ;;  %v436_v15 = vld [vmem:[%s1227_s3 + $0x50] sm:$0xff] }
  0x10   : > { %869 = vmatprep.subr.mxu0 %v303_v2  ;;  %911 = vmatprep.subr.mxu1 %v440_v6  ;;  %v298_v12 = vld [vmem:[%s1225_s1 + $0x40] sm:$0xff]  ;;  %v296_v16 = vld [vmem:[%s1225_s1 + $0x30] sm:$0xff]  ;;  %v435_v17 = vld [vmem:[%s1227_s3 + $0x48] sm:$0xff] }
  0x11   : > { %870 = vmatpush3.msra.mxu0 %v303_v2  ;;  %912 = vmatpush3.msra.mxu1 %v440_v6  ;;  %v295_v18 = vld [vmem:[%s1225_s1 + $0x28] sm:$0xff]  ;;  %v434_v19 = vld [vmem:[%s1227_s3 + $0x40] sm:$0xff]  ;;  %v433_v21 = vld [vmem:[%s1227_s3 + $0x38] sm:$0xff] }
  0x12   : > { %871 = vmatprep.subr.mxu0 %v302_v3  ;;  %913 = vmatprep.subr.mxu1 %v439_v9  ;;  %v294_v20 = vld [vmem:[%s1225_s1 + $0x20] sm:$0xff]  ;;  %v293_v22 = vld [vmem:[%s1225_s1 + $0x18] sm:$0xff]  ;;  %v432_v23 = vld [vmem:[%s1227_s3 + $0x30] sm:$0xff] }
  0x13   : > { %872 = vmatpush3.msra.mxu0 %v302_v3  ;;  %914 = vmatpush3.msra.mxu1 %v439_v9  ;;  %v292_v24 = vld [vmem:[%s1225_s1 + $0x10] sm:$0xff]  ;;  %v431_v25 = vld [vmem:[%s1227_s3 + $0x28] sm:$0xff]  ;;  %v430_v27 = vld [vmem:[%s1227_s3 + $0x20] sm:$0xff] }
  0x14   : > { %873 = vmatprep.subr.mxu0 %v301_v5  ;;  %915 = vmatprep.subr.mxu1 %v438_v11  ;;  %v291_v26 = vld [vmem:[%s1225_s1 + $0x8] sm:$0xff]  ;;  %v290_v28 = vld [vmem:[%s1225_s1] sm:$0xff]  ;;  %v284_v30 = vld [vmem:[%s1087_s19 + $0x10] sm:$0xff] }
  0x15   : > { %874 = vmatpush3.msra.mxu0 %v301_v5  ;;  %916 = vmatpush3.msra.mxu1 %v438_v11  ;;  %v283_v29 = vld [vmem:[%s1087_s19 + $0x8] sm:$0xff]  ;;  %v285_v31 = vld [vmem:[%s1087_s19 + $0x18] sm:$0xff]  ;;  %v286_v32 = vld [vmem:[%s1087_s19 + $0x20] sm:$0xff] }
  0x16   : > { %875 = vmatprep.subr.mxu0 %v300_v8  ;;  %917 = vmatprep.subr.mxu1 %v437_v13  ;;  %v287_v33 = vld [vmem:[%s1087_s19 + $0x28] sm:$0xff]  ;;  %v288_v34 = vld [vmem:[%s1087_s19 + $0x30] sm:$0xff]  ;;  %v289_v35 = vld [vmem:[%s1087_s19 + $0x38] sm:$0xff] }
  0x17   : > { %876 = vmatpush3.msra.mxu0 %v300_v8  ;;  %918 = vmatpush3.msra.mxu1 %v437_v13  ;;  %v429_v36 = vld [vmem:[%s1227_s3 + $0x18] sm:$0xff]  ;;  %v428_v37 = vld [vmem:[%s1227_s3 + $0x10] sm:$0xff]  ;;  %v427_v38 = vld [vmem:[%s1227_s3 + $0x8] sm:$0xff] }
  0x18   : > { %877 = vmatprep.subr.mxu0 %v299_v10  ;;  %919 = vmatprep.subr.mxu1 %v436_v15  ;;  %v426_v39 = vld [vmem:[%s1227_s3] sm:$0xff]  ;;  %v569_v40 = vld [vmem:[%s1229_s5 + $0x38] sm:$0xff]  ;;  %v568_v41 = vld [vmem:[%s1229_s5 + $0x30] sm:$0xff] }
  0x19   : > { %878 = vmatpush3.msra.mxu0 %v299_v10  ;;  %920 = vmatpush3.msra.mxu1 %v436_v15  ;;  %v567_v42 = vld [vmem:[%s1229_s5 + $0x28] sm:$0xff]  ;;  %v566_v43 = vld [vmem:[%s1229_s5 + $0x20] sm:$0xff]  ;;  %v565_v5 = vld [vmem:[%s1229_s5 + $0x18] sm:$0xff] }
  0x1a   : > { %879 = vmatprep.subr.mxu0 %v298_v12  ;;  %921 = vmatprep.subr.mxu1 %v435_v17  ;;  %v788_v44 = vld [vmem:[%s1226_s2] ss:$0 sm:$0xff]  ;;  %v564_v6 = vld [vmem:[%s1229_s5 + $0x10] sm:$0xff]  ;;  %v563_v7 = vld [vmem:[%s1229_s5 + $0x8] sm:$0xff] }
  0x1b   : > { %880 = vmatpush3.msra.mxu0 %v298_v12  ;;  %922 = vmatpush3.msra.mxu1 %v435_v17  ;;  %v562_v8 = vld [vmem:[%s1229_s5] sm:$0xff] }
  0x1c   : > { %881 = vmatprep.subr.mxu0 %v297_v14  ;;  %923 = vmatprep.subr.mxu1 %v434_v19  ;;  %v789_v9 = vld [vmem:[%s1228_s4] ss:$0 sm:$0xff] }
  0x1d   : > { %882 = vmatpush3.msra.mxu0 %v297_v14  ;;  %924 = vmatpush3.msra.mxu1 %v434_v19 }
  0x1e   : > { %883 = vmatprep.subr.mxu0 %v296_v16  ;;  %925 = vmatprep.subr.mxu1 %v433_v21 }
  0x1f   : > { %884 = vmatpush3.msra.mxu0 %v296_v16  ;;  %926 = vmatpush3.msra.mxu1 %v433_v21 }
  0x20   : > { %885 = vmatprep.subr.mxu0 %v295_v18  ;;  %927 = vmatprep.subr.mxu1 %v432_v23 }
  0x21   : > { %886 = vmatpush3.msra.mxu0 %v295_v18  ;;  %928 = vmatpush3.msra.mxu1 %v432_v23 }
  0x22   : > { %887 = vmatprep.subr.mxu0 %v294_v20  ;;  %929 = vmatprep.subr.mxu1 %v431_v25 }
  0x23   : > { %888 = vmatpush3.msra.mxu0 %v294_v20  ;;  %930 = vmatpush3.msra.mxu1 %v431_v25 }
  0x24   : > { %889 = vmatprep.subr.mxu0 %v293_v22  ;;  %931 = vmatprep.subr.mxu1 %v430_v27 }
  0x25   : > { %890 = vmatpush3.msra.mxu0 %v293_v22  ;;  %932 = vmatpush3.msra.mxu1 %v430_v27 }
  0x26   : > { %891 = vmatprep.subr.mxu0 %v292_v24  ;;  %933 = vmatprep.subr.mxu1 %v429_v36 }
  0x27   : > { %892 = vmatpush3.msra.mxu0 %v292_v24  ;;  %934 = vmatpush3.msra.mxu1 %v429_v36 }
  0x28   : > { %893 = vmatprep.subr.mxu0 %v291_v26  ;;  %935 = vmatprep.subr.mxu1 %v428_v37 }
  0x29   : > { %894 = vmatpush3.msra.mxu0 %v291_v26  ;;  %936 = vmatpush3.msra.mxu1 %v428_v37 }
  0x2a   : > { %895 = vmatprep.subr.mxu0 %v290_v28  ;;  %937 = vmatprep.subr.mxu1 %v427_v38 }
  0x2b   : > { %896 = vmatpush3.msra.mxu0 %v290_v28  ;;  %938 = vmatpush3.msra.mxu1 %v427_v38 }
  0x2c   : > { %898 = vmatmul.mubr.f32.vlgmr.msra.gmra.mxu0 %v283_v29  ;;  %939 = vmatprep.subr.mxu1 %v426_v39 }
  0x2d   : > { %900 = vmatprep.mubr.f32.mxu0 %v284_v30  ;;  %940 = vmatpush3.msra.mxu1 %v426_v39 }
  0x2e   : > { %953 = vmatprep.subr.mxu0 %v569_v40  ;;  %981 = vmatprep.subr.mxu1 %v569_v40 }
  0x2f   : > { %954 = vmatpush3.msra.mxu0 %v569_v40 }
  0x30   : > { %901 = vmatmul.mubr.f32.gmra.mxu0 %v285_v31  ;;  %955 = vmatprep.subr.mxu0 %v568_v41 }
  0x31   : > { %903 = vmatprep.mubr.f32.mxu0 %v286_v32  ;;  %956 = vmatpush3.msra.mxu0 %v568_v41 }
  0x32   : > { %957 = vmatprep.subr.mxu0 %v567_v42 }
  0x33   : > { %958 = vmatpush3.msra.mxu0 %v567_v42 }
  0x34   : > { %904 = vmatmul.mubr.f32.gmra.mxu0 %v287_v33  ;;  %959 = vmatprep.subr.mxu0 %v566_v43 }
  0x35   : > { %906 = vmatprep.mubr.f32.mxu0 %v288_v34  ;;  %960 = vmatpush3.msra.mxu0 %v566_v43  ;;  %v790_v34 = vld [vmem:[%s1230_s6] ss:$0 sm:$0xff] }
  0x36   : > { %961 = vmatprep.subr.mxu0 %v565_v5 }
  0x37   : > { %962 = vmatpush3.msra.mxu0 %v565_v5 }
  0x38   : > { %907 = vmatmul.mubr.f32.gmra.mxu0 %v289_v35  ;;  %963 = vmatprep.subr.mxu0 %v564_v6 }
  0x39   : > { %964 = vmatpush3.msra.mxu0 %v564_v6 }
  0x3a   : > { %965 = vmatprep.subr.mxu0 %v563_v7 }
  0x3b   : > { %966 = vmatpush3.msra.mxu0 %v563_v7 }
  0x3c   : > { %967 = vmatprep.subr.mxu0 %v562_v8 }
  0x3d   : > { %968 = vmatpush3.msra.mxu0 %v562_v8 }
  0xec   : > { %v899_v45 = vpop.f32.mrf.mxu0 }
  0xed   : > { %v385_v46 = vadd.f32 %v899_v45, %v788_v44 }
  0xee   : > { %v379_v47 = vpop.f32.mrf.mxu0 }
  0xef   : > { %v380_v48 = vadd.f32 %v788_v44, %v379_v47  ;;  %v419_v51 = vmax.f32 %v385_v46, 0.0 }
  0xf0   : > { %v902_v49 = vpop.f32.mrf.mxu0 }
  0xf1   : > { %v418_v50 = vmax.f32 %v380_v48, 0.0  ;;  %v395_v52 = vadd.f32 %v902_v49, %v788_v44 }
  0xf2   : > { %v389_v53 = vpop.f32.mrf.mxu0 }
  0xf3   : > { %v390_v54 = vadd.f32 %v788_v44, %v389_v53  ;;  %941 = vmatprep.mubr.f32.mxu1 %v418_v50  ;;  %v421_v57 = vmax.f32 %v395_v52, 0.0 }
  0xf4   : > { %v905_v55 = vpop.f32.mrf.mxu0  ;;  %942 = vmatmul.mubr.f32.vlgmr.msra.gmra.mxu1 %v419_v51 }
  0xf5   : > { %v420_v56 = vmax.f32 %v390_v54, 0.0  ;;  %989 = vmatpush3.msra.mxu1 %v569_v40  ;;  %v405_v58 = vadd.f32 %v905_v55, %v788_v44 }
  0xf6   : > { %v399_v59 = vpop.f32.mrf.mxu0  ;;  %982 = vmatprep.subr.mxu1 %v568_v41 }
  0xf7   : > { %v400_v60 = vadd.f32 %v788_v44, %v399_v59  ;;  %944 = vmatprep.mubr.f32.mxu1 %v420_v56  ;;  %990 = vmatpush3.msra.mxu1 %v568_v41  ;;  %v423_v63 = vmax.f32 %v405_v58, 0.0 }
  0xf8   : > { %v908_v61 = vpop.f32.mrf.mxu0  ;;  %945 = vmatmul.mubr.f32.gmra.mxu1 %v421_v57  ;;  %983 = vmatprep.subr.mxu1 %v567_v42 }
  0xf9   : > { %v422_v62 = vmax.f32 %v400_v60, 0.0  ;;  %991 = vmatpush3.msra.mxu1 %v567_v42  ;;  %v415_v0 = vadd.f32 %v908_v61, %v788_v44 }
  0xfa   : > { %v409_v1 = vpop.f32.mrf.mxu0  ;;  %984 = vmatprep.subr.mxu1 %v566_v43 }
  0xfb   : > { %v410_v2 = vadd.f32 %v788_v44, %v409_v1  ;;  %947 = vmatprep.mubr.f32.mxu1 %v422_v62  ;;  %992 = vmatpush3.msra.mxu1 %v566_v43  ;;  %v425_v4 = vmax.f32 %v415_v0, 0.0 }
  0xfc   : > { %948 = vmatmul.mubr.f32.gmra.mxu1 %v423_v63  ;;  %985 = vmatprep.subr.mxu1 %v565_v5 }
  0xfd   : > { %v424_v3 = vmax.f32 %v410_v2, 0.0  ;;  %993 = vmatpush3.msra.mxu1 %v565_v5 }
  0xfe   : > { %986 = vmatprep.subr.mxu1 %v564_v6 }
  0xff   : > { %950 = vmatprep.mubr.f32.mxu1 %v424_v3  ;;  %994 = vmatpush3.msra.mxu1 %v564_v6 }
 0x100   : > { %951 = vmatmul.mubr.f32.gmra.mxu1 %v425_v4  ;;  %987 = vmatprep.subr.mxu1 %v563_v7 }
 0x101   : > { %995 = vmatpush3.msra.mxu1 %v563_v7 }
 0x102   : > { %988 = vmatprep.subr.mxu1 %v562_v8 }
 0x103   : > { %996 = vmatpush3.msra.mxu1 %v562_v8 }
 0x1b4   : > { %v943_v10 = vpop.f32.mrf.mxu1 }
 0x1b5   : > { %v521_v11 = vadd.f32 %v943_v10, %v789_v9 }
 0x1b6   : > { %v515_v12 = vpop.f32.mrf.mxu1 }
 0x1b7   : > { %v516_v13 = vadd.f32 %v789_v9, %v515_v12  ;;  %v555_v16 = vmax.f32 %v521_v11, 0.0 }
 0x1b8   : > { %v946_v14 = vpop.f32.mrf.mxu1 }
 0x1b9   : > { %v554_v15 = vmax.f32 %v516_v13, 0.0  ;;  %v531_v17 = vadd.f32 %v946_v14, %v789_v9 }
 0x1ba   : > { %v525_v18 = vpop.f32.mrf.mxu1 }
 0x1bb   : > { %v526_v19 = vadd.f32 %v789_v9, %v525_v18  ;;  %969 = vmatprep.mubr.msk.f32.mxu0 %vm577_vm0, %v554_v15  ;;  %v557_v22 = vmax.f32 %v531_v17, 0.0 }
 0x1bc   : > { %v949_v20 = vpop.f32.mrf.mxu1  ;;  %970 = vmatmul.mubr.msk.f32.vlgmr.msra.gmra.mxu0 %vm577_vm0, %v555_v16 }
 0x1bd   : > { %v556_v21 = vmax.f32 %v526_v19, 0.0  ;;  %v541_v23 = vadd.f32 %v949_v20, %v789_v9 }
 0x1be   : > { %v535_v24 = vpop.f32.mrf.mxu1 }
 0x1bf   : > { %v536_v25 = vadd.f32 %v789_v9, %v535_v24  ;;  %972 = vmatprep.mubr.msk.f32.mxu0 %vm577_vm0, %v556_v21  ;;  %v559_v28 = vmax.f32 %v541_v23, 0.0 }
 0x1c0   : > { %v952_v26 = vpop.f32.mrf.mxu1  ;;  %973 = vmatmul.mubr.msk.f32.gmra.mxu0 %vm577_vm0, %v557_v22 }
 0x1c1   : > { %v558_v27 = vmax.f32 %v536_v25, 0.0  ;;  %v551_v29 = vadd.f32 %v952_v26, %v789_v9 }
 0x1c2   : > { %v545_v30 = vpop.f32.mrf.mxu1 }
 0x1c3   : > { %v546_v31 = vadd.f32 %v789_v9, %v545_v30  ;;  %975 = vmatprep.mubr.msk.f32.mxu1 %vm577_vm0, %v558_v27  ;;  %v561_v33 = vmax.f32 %v551_v29, 0.0 }
 0x1c4   : > { %976 = vmatmul.mubr.msk.f32.vlgmr.msra.gmra.mxu1 %vm577_vm0, %v559_v28 }
 0x1c5   : > { %v560_v32 = vmax.f32 %v546_v31, 0.0 }
 0x1c7   : > { %978 = vmatprep.mubr.msk.f32.mxu1 %vm577_vm0, %v560_v32 }
 0x1c8   : > { %979 = vmatmul.mubr.msk.f32.gmra.mxu1 %vm577_vm0, %v561_v33 }
 0x27c   : > { %v971_v35 = vpop.f32.mrf.mxu0 }
 0x27d   : > { %v674_v36 = vadd.f32 %v971_v35, %v790_v34 }
 0x27e   : > { %v668_v37 = vpop.f32.mrf.mxu0 }
 0x27f   : > { %v708_v38 = vmax.f32 %v674_v36, 0.0  ;;  %v669_v39 = vadd.f32 %v790_v34, %v668_v37 }
 0x280   : > { %v974_v40 = vpop.f32.mrf.mxu0 }
 0x281   : > { %716 = vst [vmem:[%s280_s17 + $0x8] sm:$0xff] %v708_v38  ;;  %v707_v41 = vmax.f32 %v669_v39, 0.0  ;;  %v684_v42 = vadd.f32 %v974_v40, %v790_v34 }
 0x282   : > { %v678_v43 = vpop.f32.mrf.mxu0 }
 0x283   : > { %715 = vst [vmem:[%s280_s17] sm:$0xff] %v707_v41  ;;  %v710_v44 = vmax.f32 %v684_v42, 0.0  ;;  %v679_v45 = vadd.f32 %v790_v34, %v678_v43 }
 0x284   : > { %v977_v46 = vpop.f32.mrf.mxu1 }
 0x285   : > { %718 = vst [vmem:[%s280_s17 + $0x18] sm:$0xff] %v710_v44  ;;  %v709_v47 = vmax.f32 %v679_v45, 0.0  ;;  %v694_v48 = vadd.f32 %v977_v46, %v790_v34 }
 0x286   : > { %v688_v49 = vpop.f32.mrf.mxu1 }
 0x287   : > { %717 = vst [vmem:[%s280_s17 + $0x10] sm:$0xff] %v709_v47  ;;  %v712_v50 = vmax.f32 %v694_v48, 0.0  ;;  %v689_v51 = vadd.f32 %v790_v34, %v688_v49 }
 0x288   : > { %v980_v52 = vpop.f32.mrf.mxu1 }
 0x289   : > { %720 = vst [vmem:[%s280_s17 + $0x28] sm:$0xff] %v712_v50  ;;  %v711_v53 = vmax.f32 %v689_v51, 0.0  ;;  %v704_v54 = vadd.f32 %v980_v52, %v790_v34 }
 0x28a   : > { %v698_v55 = vpop.f32.mrf.mxu1 }
 0x28b   : > { %719 = vst [vmem:[%s280_s17 + $0x20] sm:$0xff] %v711_v53  ;;  %v714_v56 = vmax.f32 %v704_v54, 0.0  ;;  %v699_v57 = vadd.f32 %v790_v34, %v698_v55 }
 0x28d   : > { %722 = vst [vmem:[%s280_s17 + $0x38] sm:$0xff] %v714_v56  ;;  %v713_v58 = vmax.f32 %v699_v57, 0.0 }
 0x28f   : > { %721 = vst [vmem:[%s280_s17 + $0x30] sm:$0xff] %v713_v58 }
 0x290 PF: > { %s17_s24 = sadd.s32 1, %s1011_s24  }
 0x291   : > { %p14_p4 = scmp.ge.s32.totalorder %s17_s24, 6  }
 0x293   :  { %16 = sbr.rel (!%p14_p4) target bundleno = 1 (0x1), region = 78 }

</bundles_post_ra>
